<compile_context>
chip_gen: v7x
topology: tpu7x:2x2x1
jax: 0.10.0
libtpu: 0.0.40
codegen_flags: <defaults>
</compile_context>

<pallas_src>
import jax
import jax.numpy as jnp
from jax.experimental import pallas as pl
from jax.experimental.pallas import tpu as pltpu


def _round_up(x, m):
    return ((x + m - 1) // m) * m


def _pick_col_tile(s_pad, max_cols):
    """Largest multiple of 128 that divides s_pad and is <= max_cols."""
    max_cols = max(128, (min(max_cols, s_pad) // 128) * 128)
    for ts in range(max_cols, 0, -128):
        if s_pad % ts == 0:
            return ts
    return 128


def _pick_row_tile(r, max_rows):
    """(TR, R_pad): TR multiple of 8, TR <= ~max_rows, minimal row padding."""
    n = -(-r // max_rows)                 # number of row tiles
    tr = _round_up(-(-r // n), 8)
    return tr, tr * n


def _vmem_capacity_bytes():
    try:
        info = pltpu.get_tpu_info()
        return int(getattr(info, "vmem_capacity_bytes", 128 * 1024 * 1024))
    except Exception:
        return 128 * 1024 * 1024


# ----------------------------------------------------------------------------
# Kernel 1: fused head/tail projection + fused label projection.
# ----------------------------------------------------------------------------
def _proj_kernel(enc_ref, w_ht_ref, b_ht_ref, w01_ref, head_ref, t_ref):
    # enc_ref : (1, TS, H)       compute dtype
    # w_ht_ref: (H, 2H)          [head_w.T | tail_w.T]
    # b_ht_ref: (1, 2H)          f32 [head_b | tail_b]
    # w01_ref : (H, 2H)          [w_label_0.T | w_label_1.T]
    # head_ref: (1, TS, H)       out, compute dtype
    # t_ref   : (1, 2*TS, H)     out, compute dtype (rows [0,TS)=label0, [TS,2TS)=label1)
    H = enc_ref.shape[2]
    TS = enc_ref.shape[1]
    cd = head_ref.dtype

    enc = enc_ref[0]                                                  # (TS, H)
    proj = jnp.dot(enc, w_ht_ref[...],
                   preferred_element_type=jnp.float32) + b_ht_ref[...]  # (TS, 2H) f32
    head_ref[0] = proj[:, :H].astype(cd)
    tail = proj[:, H:].astype(cd)                                     # (TS, H)

    t01 = jnp.dot(tail, w01_ref[...], preferred_element_type=jnp.float32)  # (TS, 2H)
    t_ref[0, :TS, :] = t01[:, :H].astype(cd)
    t_ref[0, TS:, :] = t01[:, H:].astype(cd)


# ----------------------------------------------------------------------------
# Kernel 2: merged-label NT score matmul, row x col tiled output.
# ----------------------------------------------------------------------------
def _score_kernel(head_ref, t_ref, out_ref):
    # head_ref: (1, TR, H)        [fields | enc_head] row tile
    # t_ref   : (1, 2*TS, H)      stacked [t0 tile ; t1 tile] for this key tile
    # out_ref : (1, 2, TR, TS)    f32
    TS = out_ref.shape[3]
    head = head_ref[0]                                                # (TR, H)
    t = t_ref[0]                                                      # (2*TS, H)

    # A @ B.T without materializing the transpose (NT contraction on the MXU).
    nt = (((1,), (1,)), ((), ()))
    s = jax.lax.dot_general(head, t, nt,
                            preferred_element_type=jnp.float32)       # (TR, 2*TS)

    out_ref[0, 0] = s[:, :TS].astype(out_ref.dtype)
    out_ref[0, 1] = s[:, TS:].astype(out_ref.dtype)


def relation_tagger_forward(enc, params, *, compute_dtype=jnp.bfloat16,
                            interpret=False):
    """enc: (B, S, H) float32. Returns score: (B, 2, F + S, S) float32."""
    B, S, H = enc.shape
    fields = params["field_embeddings"]          # (1, F, H)
    F = fields.shape[1]
    cd = compute_dtype
    cd_bytes = jnp.dtype(cd).itemsize

    # Generation-aware VMEM / tile sizing (v7x: 64 MiB/TC; v5e/v6e: 128 MiB).
    cap = _vmem_capacity_bytes()
    vmem_limit = min(cap * 3 // 4, 100 * 1024 * 1024)
    big_vmem = cap >= 96 * 1024 * 1024
    ts_max = 1024 if big_vmem else 512
    tr_max = 1024 if big_vmem else 512

    # Host-side weight fusion (PyTorch (out,in) -> (in,out), concat on out dim).
    w_ht = jnp.concatenate([params["head_w"].T, params["tail_w"].T], axis=1).astype(cd)
    b_ht = jnp.concatenate([params["head_b"], params["tail_b"]]).reshape(1, 2 * H)
    b_ht = b_ht.astype(jnp.float32)   # bias added to the f32 accumulator
    w_01 = jnp.concatenate([params["w_label_0"].T, params["w_label_1"].T], axis=1).astype(cd)

    # Key/sequence padding: multiple of 128 (lane-dense score columns).
    S_pad = _round_up(S, 128)
    TS = _pick_col_tile(S_pad, ts_max)
    n_s = S_pad // TS

    enc_p = enc if S_pad == S else jnp.pad(enc, ((0, 0), (0, S_pad - S), (0, 0)))
    enc_p = enc_p.astype(cd)

    const2d = lambda b, r: (0, 0)
    proj_cost = pl.CostEstimate(
        flops=8 * B * S_pad * H * H,
        transcendentals=0,
        bytes_accessed=(B * S_pad * H * cd_bytes            # enc in
                        + 2 * (H * 2 * H) * cd_bytes        # fused weights
                        + 2 * H * 4                         # bias
                        + B * S_pad * H * cd_bytes          # head out
                        + B * 2 * S_pad * H * cd_bytes))    # t_stack out

    head, t_stack = pl.pallas_call(
        _proj_kernel,
        out_shape=(jax.ShapeDtypeStruct((B, S_pad, H), cd),
                   jax.ShapeDtypeStruct((B, 2 * S_pad, H), cd)),
        grid_spec=pltpu.PrefetchScalarGridSpec(
            num_scalar_prefetch=0,
            grid=(B, n_s),
            in_specs=[
                pl.BlockSpec((1, TS, H), lambda b, r: (b, r, 0)),
                pl.BlockSpec((H, 2 * H), const2d),
                pl.BlockSpec((1, 2 * H), const2d),
                pl.BlockSpec((H, 2 * H), const2d),
            ],
            out_specs=[
                pl.BlockSpec((1, TS, H), lambda b, r: (b, r, 0)),
                pl.BlockSpec((1, 2 * TS, H), lambda b, r: (b, r, 0)),
            ],
        ),
        compiler_params=pltpu.CompilerParams(
            dimension_semantics=("parallel", "parallel"),
            vmem_limit_bytes=vmem_limit,
        ),
        cost_estimate=proj_cost,
        interpret=interpret,
    )(enc_p, w_ht, b_ht, w_01)
    # TODO(synk): single-buffer the constant-index weight blocks with
    # pipeline_mode=pl.Buffered(1) once verified on the deployed jax version.

    # Fold fields into the query operand host-side (no tiny FP-row matmuls in
    # the kernel); pad query rows to a multiple of the row tile.
    fields_b = jnp.broadcast_to(fields, (B, F, H)).astype(cd)
    head_cat = jnp.concatenate([fields_b, head], axis=1)       # (B, F + S_pad, H)
    R_in = F + S_pad
    TR, R_pad = _pick_row_tile(R_in, tr_max)
    if R_pad != R_in:
        head_cat = jnp.pad(head_cat, ((0, 0), (0, R_pad - R_in), (0, 0)))

    n_row = R_pad // TR
    score_cost = pl.CostEstimate(
        flops=4 * B * R_pad * S_pad * H,
        transcendentals=0,
        bytes_accessed=(B * R_pad * H * cd_bytes
                        + B * 2 * S_pad * H * cd_bytes
                        + B * 2 * R_pad * S_pad * 4))

    score = pl.pallas_call(
        _score_kernel,
        out_shape=jax.ShapeDtypeStruct((B, 2, R_pad, S_pad), jnp.float32),
        grid_spec=pltpu.PrefetchScalarGridSpec(
            num_scalar_prefetch=0,
            grid=(B, n_row, n_s),
            in_specs=[
                pl.BlockSpec((1, TR, H), lambda b, r, c: (b, r, 0)),
                pl.BlockSpec((1, 2 * TS, H), lambda b, r, c: (b, c, 0)),
            ],
            out_specs=pl.BlockSpec((1, 2, TR, TS), lambda b, r, c: (b, 0, r, c)),
        ),
        compiler_params=pltpu.CompilerParams(
            # batch + query-row tiles are megacore-parallel (>=2 work items even
            # at B==1); key tiles innermost keep the head block resident.
            dimension_semantics=("parallel", "parallel", "arbitrary"),
            vmem_limit_bytes=vmem_limit,
        ),
        cost_estimate=score_cost,
        interpret=interpret,
    )(head_cat, t_stack)

    # TODO(synk): consumers able to take the padded (R_pad, S_pad) layout should
    # skip this slice; it costs a full extra HBM round trip of the score.
    if R_pad == F + S and S_pad == S:
        return score
    return score[:, :, :F + S, :S]


def relation_tagger_reference(enc, params):
    """Plain-JAX f32 reference matching the PyTorch forward."""
    B = enc.shape[0]
    enc_head = enc @ params["head_w"].T + params["head_b"]
    enc_tail = enc @ params["tail_w"].T + params["tail_b"]
    fields = jnp.broadcast_to(
        params["field_embeddings"],
        (B,) + params["field_embeddings"].shape[1:],
    )
    head_cat = jnp.concatenate([fields, enc_head], axis=1)
    t0 = enc_tail @ params["w_label_0"].T
    t1 = enc_tail @ params["w_label_1"].T
    s0 = jnp.einsum("bqh,bkh->bqk", head_cat, t0)
    s1 = jnp.einsum("bqh,bkh->bqk", head_cat, t1)
    return jnp.stack([s0, s1], axis=1)


def init_params(key, n_fields, hidden_size):
    ks = jax.random.split(key, 7)
    H = hidden_size
    scale = 1.0 / jnp.sqrt(H)
    return {
        # PyTorch nn.Linear weight layout: (out_features, in_features)
        "head_w": jax.random.uniform(ks[0], (H, H), jnp.float32, -scale, scale),
        "head_b": jax.random.uniform(ks[1], (H,), jnp.float32, -scale, scale),
        "tail_w": jax.random.uniform(ks[2], (H, H), jnp.float32, -scale, scale),
        "tail_b": jax.random.uniform(ks[3], (H,), jnp.float32, -scale, scale),
        # field_embeddings: torch.rand(1, n_fields, H) -> uniform [0, 1)
        "field_embeddings": jax.random.uniform(
            ks[4], (1, n_fields, H), jnp.float32, 0.0, 1.0
        ),
        "w_label_0": jax.random.uniform(ks[5], (H, H), jnp.float32, -scale, scale),
        "w_label_1": jax.random.uniform(ks[6], (H, H), jnp.float32, -scale, scale),
    }


if __name__ == "__main__":
    B, S, H, n_fields = 2, 8, 32, 4

    key = jax.random.PRNGKey(0)
    k_enc, k_params = jax.random.split(key)
    enc = jax.random.normal(k_enc, (B, S, H), jnp.float32)
    params = init_params(k_params, n_fields, H)

    ref = relation_tagger_reference(enc, params)

    # f32 compute path: strict numerical check vs the PyTorch-equivalent reference.
    score_f32 = relation_tagger_forward(enc, params, compute_dtype=jnp.float32)
    score_f32 = jax.block_until_ready(score_f32)
    assert score_f32.shape == (B, 2, n_fields + S, S), score_f32.shape
    assert jnp.allclose(score_f32, ref, atol=1e-4, rtol=1e-4), "f32 mismatch vs reference"

    # Default (bf16 MXU) path: same kernels, coarser tolerance due to bf16 inputs.
    score = relation_tagger_forward(enc, params)
    score = jax.block_until_ready(score)
    assert score.shape == (B, 2, n_fields + S, S), score.shape
    assert jnp.allclose(score, ref, atol=0.5, rtol=0.05), "bf16 mismatch vs reference"

    print("KERNEL_OK")
</pallas_src>

<mosaic_0001>
module attributes {stable_mosaic.version = 11 : i64} {
  func.func @_proj_kernel(%arg0: i32, %arg1: i32, %arg2: memref<1x128x32xf32, #tpu.memory_space<vmem>>, %arg3: memref<32x64xf32, #tpu.memory_space<vmem>>, %arg4: memref<1x64xf32, #tpu.memory_space<vmem>>, %arg5: memref<32x64xf32, #tpu.memory_space<vmem>>, %arg6: memref<1x128x32xf32, #tpu.memory_space<vmem>>, %arg7: memref<1x256x32xf32, #tpu.memory_space<vmem>>) attributes {dimension_semantics = [#tpu.dimension_semantics<parallel>, #tpu.dimension_semantics<parallel>], iteration_bounds = array<i64: 2, 1>, scalar_prefetch = 0 : i64, scratch_operands = 0 : i64, tpu.core_type = #tpu.core_type<tc>, window_params = [{transform_indices = @transform_0, window_bounds = array<i64: 1, 128, 32>}, {pipeline_mode = #tpu.pipeline_mode<synchronous>, transform_indices = @transform_1, window_bounds = array<i64: 32, 64>}, {pipeline_mode = #tpu.pipeline_mode<synchronous>, transform_indices = @transform_2, window_bounds = array<i64: 1, 64>}, {pipeline_mode = #tpu.pipeline_mode<synchronous>, transform_indices = @transform_3, window_bounds = array<i64: 32, 64>}, {transform_indices = @transform_4, window_bounds = array<i64: 1, 128, 32>}, {transform_indices = @transform_5, window_bounds = array<i64: 1, 256, 32>}]} {
    %c0 = arith.constant 0 : index
    %c0_0 = arith.constant 0 : index
    %c0_1 = arith.constant 0 : index
    %0 = vector.load %arg2[%c0, %c0_0, %c0_1] : memref<1x128x32xf32, #tpu.memory_space<vmem>>, vector<1x128x32xf32>
    %1 = vector.shape_cast %0 : vector<1x128x32xf32> to vector<128x32xf32>
    %c0_2 = arith.constant 0 : index
    %c0_3 = arith.constant 0 : index
    %2 = vector.load %arg3[%c0_2, %c0_3] : memref<32x64xf32, #tpu.memory_space<vmem>>, vector<32x64xf32>
    %cst = arith.constant dense<0.000000e+00> : vector<128x64xf32>
    %3 = tpu.matmul %1, %2, %cst {dimension_numbers = #tpu.dot_dimension_numbers<[1], [0], [0], [1], [0, 0, 1, 1], [], []>} : vector<128x32xf32>, vector<32x64xf32>, vector<128x64xf32> -> vector<128x64xf32>
    %c0_4 = arith.constant 0 : index
    %c0_5 = arith.constant 0 : index
    %4 = vector.load %arg4[%c0_4, %c0_5] : memref<1x64xf32, #tpu.memory_space<vmem>>, vector<1x64xf32>
    %5 = vector.broadcast %4 : vector<1x64xf32> to vector<128x64xf32>
    %6 = arith.addf %3, %5 : vector<128x64xf32>
    %7 = vector.extract_strided_slice %6 {offsets = [0, 0], sizes = [128, 32], strides = [1, 1]} : vector<128x64xf32> to vector<128x32xf32>
    %c0_6 = arith.constant 0 : index
    %c0_7 = arith.constant 0 : index
    %c0_8 = arith.constant 0 : index
    %8 = vector.load %arg6[%c0_6, %c0_7, %c0_8] : memref<1x128x32xf32, #tpu.memory_space<vmem>>, vector<1x128x32xf32>
    %9 = vector.shape_cast %8 : vector<1x128x32xf32> to vector<128x32xf32>
    %10 = vector.shape_cast %7 : vector<128x32xf32> to vector<1x128x32xf32>
    tpu.vector_store %arg6[%c0_6, %c0_7, %c0_8], %10 {strides = array<i32>} : memref<1x128x32xf32, #tpu.memory_space<vmem>>, vector<1x128x32xf32>,
    %11 = vector.extract_strided_slice %6 {offsets = [0, 32], sizes = [128, 32], strides = [1, 1]} : vector<128x64xf32> to vector<128x32xf32>
    %c0_9 = arith.constant 0 : index
    %c0_10 = arith.constant 0 : index
    %12 = vector.load %arg5[%c0_9, %c0_10] : memref<32x64xf32, #tpu.memory_space<vmem>>, vector<32x64xf32>
    %cst_11 = arith.constant dense<0.000000e+00> : vector<128x64xf32>
    %13 = tpu.matmul %11, %12, %cst_11 {dimension_numbers = #tpu.dot_dimension_numbers<[1], [0], [0], [1], [0, 0, 1, 1], [], []>} : vector<128x32xf32>, vector<32x64xf32>, vector<128x64xf32> -> vector<128x64xf32>
    %14 = vector.extract_strided_slice %13 {offsets = [0, 0], sizes = [128, 32], strides = [1, 1]} : vector<128x64xf32> to vector<128x32xf32>
    %c0_12 = arith.constant 0 : index
    %c0_13 = arith.constant 0 : index
    %c0_14 = arith.constant 0 : index
    %15 = vector.load %arg7[%c0_12, %c0_13, %c0_14] : memref<1x256x32xf32, #tpu.memory_space<vmem>>, vector<1x128x32xf32>
    %16 = vector.shape_cast %15 : vector<1x128x32xf32> to vector<128x32xf32>
    %17 = vector.shape_cast %14 : vector<128x32xf32> to vector<1x128x32xf32>
    tpu.vector_store %arg7[%c0_12, %c0_13, %c0_14], %17 {strides = array<i32>} : memref<1x256x32xf32, #tpu.memory_space<vmem>>, vector<1x128x32xf32>,
    %18 = vector.extract_strided_slice %13 {offsets = [0, 32], sizes = [128, 32], strides = [1, 1]} : vector<128x64xf32> to vector<128x32xf32>
    %c0_15 = arith.constant 0 : index
    %c128 = arith.constant 128 : index
    %c0_16 = arith.constant 0 : index
    %19 = vector.load %arg7[%c0_15, %c128, %c0_16] : memref<1x256x32xf32, #tpu.memory_space<vmem>>, vector<1x128x32xf32>
    %20 = vector.shape_cast %19 : vector<1x128x32xf32> to vector<128x32xf32>
    %21 = vector.shape_cast %18 : vector<128x32xf32> to vector<1x128x32xf32>
    tpu.vector_store %arg7[%c0_15, %c128, %c0_16], %21 {strides = array<i32>} : memref<1x256x32xf32, #tpu.memory_space<vmem>>, vector<1x128x32xf32>,
    return
  }
  func.func @transform_0(%arg0: i32, %arg1: i32) -> (i32, i32, i32) {
    %c0_i32 = arith.constant 0 : i32
    %c0_i32_0 = arith.constant 0 : i32
    return %arg0, %arg1, %c0_i32 : i32, i32, i32
  }
  func.func @transform_1(%arg0: i32, %arg1: i32) -> (i32, i32) {
    %c0_i32 = arith.constant 0 : i32
    %c0_i32_0 = arith.constant 0 : i32
    %c0_i32_1 = arith.constant 0 : i32
    return %c0_i32, %c0_i32_0 : i32, i32
  }
  func.func @transform_2(%arg0: i32, %arg1: i32) -> (i32, i32) {
    %c0_i32 = arith.constant 0 : i32
    %c0_i32_0 = arith.constant 0 : i32
    %c0_i32_1 = arith.constant 0 : i32
    return %c0_i32, %c0_i32_0 : i32, i32
  }
  func.func @transform_3(%arg0: i32, %arg1: i32) -> (i32, i32) {
    %c0_i32 = arith.constant 0 : i32
    %c0_i32_0 = arith.constant 0 : i32
    %c0_i32_1 = arith.constant 0 : i32
    return %c0_i32, %c0_i32_0 : i32, i32
  }
  func.func @transform_4(%arg0: i32, %arg1: i32) -> (i32, i32, i32) {
    %c0_i32 = arith.constant 0 : i32
    %c0_i32_0 = arith.constant 0 : i32
    return %arg0, %arg1, %c0_i32 : i32, i32, i32
  }
  func.func @transform_5(%arg0: i32, %arg1: i32) -> (i32, i32, i32) {
    %c0_i32 = arith.constant 0 : i32
    %c0_i32_0 = arith.constant 0 : i32
    return %arg0, %arg1, %c0_i32 : i32, i32, i32
  }
}

</mosaic_0001>

<bundles_post_ra>
// kernel: tpu_custom_call.1
= control target key start
LH: loop header
LB: loop body
LE: loop exit
PB: predicated region body
PF: predicated region fallthrough
CT: control target
= control target key end

     0   :  { %11 = vsyncpa [#allocation3], 0  ;;  %s2151_s0 = inlined_call_operand.hbm [shape: f32[2,128,32], index: 0, kind: input, shape index: {}]   ;;  %s2152_s1 = inlined_call_operand.hbm [shape: f32[32,64], index: 1, kind: input, shape index: {}]   ;;  %s2153_s2 = inlined_call_operand.hbm [shape: f32[1,64], index: 2, kind: input, shape index: {}]   ;;  %s2154_s3 = inlined_call_operand.hbm [shape: f32[32,64], index: 3, kind: input, shape index: {}]   ;;  %s2155_s4 = inlined_call_operand.hbm [shape: f32[2,128,32], index: 4, kind: output, shape index: {0}]   ;;  %s2156_s5 = inlined_call_operand.hbm [shape: f32[2,256,32], index: 5, kind: output, shape index: {1}]  }
   0x1   :  { %13 = vsyncpa [#allocation3 + $0x1], 0 }
   0x2   :  { %14 = vsyncpa [#allocation6], 0 }
   0x3   :  { %15 = vsyncpa [#allocation9], 0 }
   0x4   :  { %16 = vsyncpa [#allocation4], 0 }
   0x5   :  { %18 = vsyncpa [#allocation4 + $0x1], 0 }
   0x6   :  { %19 = vsyncpa [#allocation12], 0 }
   0x7   :  { %21 = vsyncpa [#allocation12 + $0x1], 0  ;;  %s1634_s18 = smov 0   ;;  %s1636_s19 = smov 0  }
   0x8   :  { %s1638_s20 = smov 0   ;;  %s1640_s21 = smov 0  }
   0x9   :  { %s1642_s22 = smov 0   ;;  %s1644_s23 = smov 0  }
   0xa LB: > { %2163 = sst [smem:[#allocation18_spill]] %s1571_s18  ;;  %s1071_s24 = sadd.s32 4294967295, %s1591_s23   ;;  %s1591_s23 = sphi %s1644_s23, %s27_s23   ;;  %s1587_s22 = sphi %s1642_s22, %s2186_s22   ;;  %s1583_s21 = sphi %s1640_s21, %s2185_s21   ;;  %s1579_s20 = sphi %s1638_s20, %s2184_s20   ;;  %s1575_s19 = sphi %s1636_s19, %s2183_s19   ;;  %s1571_s18 = sphi %s1634_s18, %s2182_s18  }
   0xb   : > { %s1072_s25 = sadd.s32 4294967294, %s1591_s23   ;;  %p61_p0 = scmp.ne.s32.totalorder %s1575_s19, %s1571_s18 }
   0xc   : > { %p1668_p1 = scmp.eq.s32.totalorder %s1071_s24, 0  ;;  %p1672_p2 = scmp.eq.s32.totalorder %s1071_s24, 1 }
   0xd   : > { %p156_p3 = scmp.eq.s32.totalorder %s1072_s25, 1  ;;  %p1073_p5 = scmp.ge.s32.totalorder %s1591_s23, 1 }
   0xe   : > { %s2164_s26 = scalar_select %p1668_p1, 1, 0 }
   0xf   : > { %s2165_s27 = scalar_select %p1672_p2, 1, 0 }
  0x10   : > { %p1678_p4 = por %p1668_p1, %p61_p0  ;;  %p1683_p6 = por %p156_p3, %p61_p0 }
  0x11   : > { %p191_p7 = scmp.lt.s32.totalorder %s1591_s23, 3  ;;  %s1593_s6 = smov [#allocation5]  }
  0x12   : > { %s2166_s28 = scalar_select %p1678_p4, 1, 0 }
  0x13   : > { %s2167_s29 = scalar_select %p1683_p6, 1, 0 }
  0x14   : > { %p1688_p8 = pnand %p1073_p5, %p191_p7  ;;  %s203_s7 = sshll.u32 %s1593_s6, 4  ;;  %s1692_s7 = int_to_ptr.vmem [resolvable:$true] %s203_s7 }
  0x15   : > { %2168 = sst [smem:[#allocation19_spill]] %s2167_s29  ;;  %s1594_s9 = smov [#allocation7]  }
  0x16   : > { %s2169_s30 = scalar_select %p1688_p8, 1, 0 }
  0x17   : > { %p1270_p9 = pneg %p1688_p8  ;;  %s217_s10 = sshll.u32 %s1594_s9, 4  ;;  %s1703_s10 = int_to_ptr.vmem [resolvable:$true] %s217_s10 }
  0x18   : > { %s1595_s11 = smov [#allocation8]   ;;  %s1355_s15 = scalar_lea.hbm %s2152_s1, 512 }
  0x19   : > { %p1699_p11 = pnand %p1270_p9, %p1668_p1  ;;  %s1705_s12 = sshll.u32 %s1595_s11, 4  ;;  %s228_s12 = int_to_ptr.vmem [resolvable:$true] %s1705_s12 }
  0x1a   : > { %p1356_p12 = scmp.ne.s32.totalorder %s2152_s1, %s1355_s15  ;;  %p1362_p5 = scmp.lt.u32.totalorder %s1355_s15, %s2152_s1 }
  0x1b   : > { %p1715_p13 = pneg %p1699_p11 }
  0x1d   : > { %p1358_p0 = pnand %p1715_p13, %p1356_p12 }
  0x1f   : > { %p1359_p3 = pneg %p1358_p0 }
  0x21   : > { %p1364_p7 = pnand %p1362_p5, %p1359_p3 }
  0x23   : > { %1367 = shalt.err (!%p1364_p7)
}
  0x24   : > { %s1368_s9 = scalar_lea.vmem %s1692_s7, 512  ;;  %p1376_p1 = scmp.lt.s32.totalorder %s1692_s7, %s1692_s7 }
  0x25   : > { %p1369_p9 = scmp.ne.s32.totalorder %s1692_s7, %s1368_s9  ;;  %p1377_p4 = scmp.lt.s32.totalorder %s1368_s9, %s1368_s9 }
  0x27   : > { %p1371_p10 = pnand %p1369_p9, %p1715_p13  ;;  %p1378_p12 = por %p1377_p4, %p1376_p1 }
  0x29   : > { %p1372_p6 = pneg %p1371_p10 }
  0x2b   : > { %p1379_p0 = pnand %p1378_p12, %p1372_p6 }
  0x2d   : > { %1382 = shalt.err (!%p1379_p0)
}
  0x2e   : > { %s1596_s11 = smov 128   ;;  %s1597_s13 = smov 8  }
  0x2f   : > { %1273 = dma.hbm_to_vmem [thread:$0]  (!%p1699_p11), %s2152_s1, 512, %s1692_s7, [#allocation6], %s1596_s11, %s1596_s11, %s1597_s13  }
  0x30   : > { %s1383_s25 = scalar_lea.hbm %s2153_s2, 16 }
  0x31   : > { %p1384_p1 = scmp.ne.s32.totalorder %s2153_s2, %s1383_s25  ;;  %p1390_p10 = scmp.lt.u32.totalorder %s1383_s25, %s2153_s2 }
  0x33   : > { %p1386_p4 = pnand %p1384_p1, %p1715_p13 }
  0x35   : > { %p1387_p6 = pneg %p1386_p4 }
  0x37   : > { %p1392_p3 = pnand %p1390_p10, %p1387_p6 }
  0x39   : > { %1395 = shalt.err (!%p1392_p3)
}
  0x3a   : > { %s1396_s7 = scalar_lea.vmem %s1703_s10, 16  ;;  %s1403_s14 = scalar_lea.vmem %s1703_s10, 32 }
  0x3b   : > { %p1397_p5 = scmp.ne.s32.totalorder %s1703_s10, %s1396_s7  ;;  %p1404_p12 = scmp.lt.s32.totalorder %s1703_s10, %s1703_s10 }
  0x3c   : > { %p1405_p0 = scmp.lt.s32.totalorder %s1403_s14, %s1396_s7 }
  0x3d   : > { %p1399_p7 = pnand %p1397_p5, %p1715_p13 }
  0x3e   : > { %p1406_p1 = por %p1405_p0, %p1404_p12 }
  0x3f   : > { %p1400_p9 = pneg %p1399_p7 }
  0x41   : > { %p1407_p4 = pnand %p1406_p1, %p1400_p9 }
  0x43   : > { %1410 = shalt.err (!%p1407_p4)
}
  0x44   : > { %1276 = dma.hbm_to_vmem [thread:$0]  (!%p1699_p11), %s2153_s2, 16, %s1703_s10, [#allocation6]  }
  0x45   : > { %s1411_s17 = scalar_lea.hbm %s2154_s3, 512 }
  0x46   : > { %p1412_p6 = scmp.ne.s32.totalorder %s2154_s3, %s1411_s17  ;;  %p1418_p5 = scmp.lt.u32.totalorder %s1411_s17, %s2154_s3 }
  0x48   : > { %p1414_p10 = pnand %p1412_p6, %p1715_p13 }
  0x4a   : > { %p1415_p3 = pneg %p1414_p10 }
  0x4c   : > { %p1420_p7 = pnand %p1418_p5, %p1415_p3 }
  0x4e   : > { %1423 = shalt.err (!%p1420_p7)
}
  0x4f   : > { %s1424_s14 = scalar_lea.vmem %s228_s12, 512  ;;  %p1432_p1 = scmp.lt.s32.totalorder %s228_s12, %s228_s12 }
  0x50   : > { %p1425_p9 = scmp.ne.s32.totalorder %s228_s12, %s1424_s14  ;;  %p1433_p4 = scmp.lt.s32.totalorder %s1424_s14, %s1424_s14 }
  0x52   : > { %p1427_p12 = pnand %p1425_p9, %p1715_p13  ;;  %p1434_p8 = por %p1433_p4, %p1432_p1 }
  0x54   : > { %p1428_p0 = pneg %p1427_p12 }
  0x56   : > { %p1435_p2 = pnand %p1434_p8, %p1428_p0 }
  0x58   : > { %1438 = shalt.err (!%p1435_p2)
}
  0x59   : > { %1279 = dma.hbm_to_vmem [thread:$0]  (!%p1699_p11), %s2154_s3, 512, %s228_s12, [#allocation9], %s1596_s11, %s1596_s11, %s1597_s13  }
  0x5a   : > { %s48_s24 = sadd.s32 1, %s1579_s20  ;;  %s39_s8 = sadd.s32 1, %s1587_s22 }
  0x5b   : > { %p55_p2 = scmp.ne.s32.totalorder %s1579_s20, %s1575_s19  ;;  %p41_p8 = scmp.ge.s32.totalorder %s39_s8, 2 }
  0x5c   : > { %p56_p13 = scmp.eq.s32.totalorder %s1591_s23, 0  ;;  %p2172_p6 = scmp.ne.s32.totalorder %s2165_s27, 0 }
  0x5d   : > { %p1294_p3 = scmp.lt.s32.totalorder %s1591_s23, 2  ;;  %s2188_s8 = smov (%p41_p8, %s39_s8), 0 }
  0x5e   : > { %p1792_p10 = por %p2172_p6, %p55_p2  ;;  %p57_p5 = por %p56_p13, %p55_p2 }
  0x5f   : > { %s241_s15 = sand.u32 1, %s1579_s20   ;;  %s43_s16 = ssub.s32 %s1587_s22, %s2188_s8 }
  0x60   : > { %p46_p7 = scmp.eq.s32.totalorder %s43_s16, 0  ;;  %s1078_s12 = sshll.u32 %s241_s15, 7 }
  0x61   : > { %s1129_s17 = sshll.u32 %s1587_s22, 11  ;;  %s245_s7 = scalar_lea.vmem [#allocation2], %s1078_s12 }
  0x62   : > { %s1804_s25 = scalar_select %p46_p7, %s1579_s20, %s48_s24  }
  0x63   : > { %s1809_s27 = scalar_lea.hbm %s2151_s0, %s1129_s17  ;;  %s254_s14 = sshll.u32 %s245_s7, 4  ;;  %s1811_s14 = int_to_ptr.vmem [resolvable:$true] %s254_s14 }
  0x64   : > { %p1815_p11 = pnand %p1294_p3, %p57_p5  ;;  %s1819_s18 = scalar_lea.sflag [#allocation3], %s241_s15 }
  0x65   : > { %s1439_s24 = scalar_lea.hbm %s1809_s27, 2048  ;;  %s1444_s17 = scalar_lea.hbm %s2151_s0, 4096 }
  0x66   : > { %p1440_p9 = scmp.ne.s32.totalorder %s1809_s27, %s1439_s24  ;;  %p1441_p12 = pneg %p1815_p11 }
  0x67   : > { %p1445_p4 = scmp.lt.u32.totalorder %s1809_s27, %s2151_s0  ;;  %p1446_p2 = scmp.lt.u32.totalorder %s1444_s17, %s1439_s24 }
  0x68   : > { %p1442_p0 = pnand %p1441_p12, %p1440_p9  ;;  %p1448_p13 = scmp.lt.u32.totalorder %s1439_s24, %s1809_s27 }
  0x69   : > { %p1447_p8 = por %p1446_p2, %p1445_p4 }
  0x6a   : > { %p1443_p1 = pneg %p1442_p0 }
  0x6b   : > { %p1449_p6 = por %p1448_p13, %p1447_p8 }
  0x6d   : > { %p1450_p3 = pnand %p1449_p6, %p1443_p1 }
  0x6f   : > { %1453 = shalt.err (!%p1450_p3)
}
  0x70   : > { %s1454_s15 = scalar_lea.vmem %s1811_s14, 2048  ;;  %s1598_s7 = smov [#allocation2]  }
  0x71   : > { %p1455_p5 = scmp.ne.s32.totalorder %s1811_s14, %s1454_s15  ;;  %s1459_s16 = sshll.u32 %s1598_s7, 4  ;;  %s1460_s16 = int_to_ptr.vmem [resolvable:$false] %s1459_s16 }
  0x72   : > { %s1461_s12 = scalar_lea.vmem %s1460_s16, 4096  ;;  %p1462_p0 = scmp.lt.s32.totalorder %s1811_s14, %s1460_s16 }
  0x73   : > { %p1457_p7 = pnand %p1455_p5, %p1441_p12  ;;  %p1463_p4 = scmp.lt.s32.totalorder %s1461_s12, %s1454_s15 }
  0x75   : > { %p1458_p9 = pneg %p1457_p7  ;;  %p1464_p2 = por %p1463_p4, %p1462_p0 }
  0x77   : > { %p1465_p8 = pnand %p1464_p2, %p1458_p9 }
  0x79   : > { %1468 = shalt.err (!%p1465_p8)
}
  0x7a   : > { %1283 = dma.hbm_to_vmem [thread:$0]  (!%p1815_p11), %s1809_s27, 2048, %s1811_s14, %s1819_s18, %s1596_s11, %s1596_s11, %s1597_s13  }
  0x7b   : > { %p2175_p12 = scmp.ne.s32.totalorder %s2169_s30, 0 }
  0x7c   : > { %s1853_s24 = sand.u32 (!%p2175_p12), 1, %s1575_s19   ;;  %p2176_p1 = scmp.ne.s32.totalorder (!%p2175_p12), %s2166_s28, 0 }
  0x7d   : > { %266 = sbr.rel (%p2175_p12) target bundleno = 866 (0x362), region = 36  ;;  %s1082_s17 = sshll.u32 (!%p2175_p12), %s1853_s24, 7 }
  0x7e   : > { %s269_s6 = scalar_lea.sflag (!%p2175_p12), [#allocation3], %s1853_s24  ;;  %s1859_s10 = scalar_lea.vmem (!%p2175_p12), [#allocation2], %s1082_s17 }
  0x84   : > { %1550 = dma.done.wait (%p2176_p1), %s269_s6, 2048  }
  0x85   : > { %1552 = vsyncadd (%p2176_p1), %s269_s6, 4294965248  ;;  %p2177_p11 = scmp.ne.s32.totalorder %s2164_s26, 0 }
  0x87   : > { %1554 = dma.done.wait (%p2177_p11), [#allocation6], 528  }
  0x88   : > { %1556 = vsyncadd (%p2177_p11), [#allocation6], 4294966768 }
  0x89   : > { %1558 = dma.done.wait (%p2177_p11), [#allocation9], 512  }
  0x8a   : > { %1560 = vsyncadd (%p2177_p11), [#allocation9], 4294966784  ;;  %vm346_vm0 = vcmask 261120   ;;  %v335_v0 = vld [vmem:[#allocation5] sm:$0xff]  ;;  %v336_v1 = vld [vmem:[#allocation5 + $0x8] sm:$0xff]  ;;  %s1907_s26 = scalar_lea.vmem [#allocation10], %s1082_s17 }
  0x8b   : > { %v337_v2 = vld [vmem:[#allocation5 + $0x10] sm:$0xff]  ;;  %v1236_v3 = vpack.c.bf16 %v336_v1, %v335_v0  ;;  %v338_v4 = vld [vmem:[#allocation5 + $0x18] sm:$0xff]  ;;  %v319_v5 = vld [vmem:[%s1859_s10] sm:$0xff]  ;;  %s1599_s28 = smov 96   ;;  %s1087_s30 = sshll.u32 %s1853_s24, 8 }
  0x8c   : > { %v1240_v6 = vpack.c.bf16 %v338_v4, %v337_v2  ;;  %1180 = vmatprep.mubr.msk.f32.mxu0 %vm346_vm0, %v319_v5  ;;  %v320_v7 = vld [vmem:[%s1859_s10 + $0x8] sm:$0xff]  ;;  %v321_v8 = vld [vmem:[%s1859_s10 + $0x10] sm:$0xff]  ;;  %v322_v9 = vld [vmem:[%s1859_s10 + $0x18] sm:$0xff]  ;;  %s1974_s11 = scalar_lea.vmem [#allocation11], %s1087_s30  ;;  %s1130_s13 = sshll.u32 %s1583_s21, 11 }
  0x8d   : > { %1237 = vmatprep.subr.bf16.mxu0 %v1236_v3  ;;  %v323_v10 = vld [vmem:[%s1859_s10 + $0x20] sm:$0xff]  ;;  %v324_v11 = vld [vmem:[%s1859_s10 + $0x28] sm:$0xff]  ;;  %v325_v12 = vld [vmem:[%s1859_s10 + $0x30] sm:$0xff]  ;;  %s902_s27 = sshll.u32 %s1907_s26, 4  ;;  %s2008_s9 = scalar_lea.hbm %s2155_s4, %s1130_s13  ;;  %s2013_s27 = int_to_ptr.vmem [resolvable:$true] %s902_s27 }
  0x8e   : > { %1239 = vmatpush3.bf16.msra.mxu0 %v1236_v3  ;;  %v326_v13 = vld [vmem:[%s1859_s10 + $0x38] sm:$0xff]  ;;  %v327_v14 = vld [vmem:[%s1859_s10 + $0x40] sm:$0xff]  ;;  %v328_v15 = vld [vmem:[%s1859_s10 + $0x48] sm:$0xff]  ;;  %s882_s15 = scalar_lea.sflag [#allocation4], %s1853_s24  ;;  %s1469_s7 = scalar_lea.vmem %s2013_s27, 2048 }
  0x8f   : > { %1241 = vmatprep.subr.bf16.mxu0 %v1240_v6  ;;  %v329_v16 = vld [vmem:[%s1859_s10 + $0x50] sm:$0xff]  ;;  %v330_v17 = vld [vmem:[%s1859_s10 + $0x58] sm:$0xff]  ;;  %v331_v18 = vld [vmem:[%s1859_s10 + $0x60] sm:$0xff]  ;;  %p1470_p13 = scmp.ne.s32.totalorder %s2013_s27, %s1469_s7  ;;  %s1600_s16 = smov [#allocation10]  }
  0x90   : > { %v332_v19 = vld [vmem:[%s1859_s10 + $0x68] sm:$0xff]  ;;  %v333_v20 = vld [vmem:[%s1859_s10 + $0x70] sm:$0xff]  ;;  %v334_v21 = vld [vmem:[%s1859_s10 + $0x78] sm:$0xff]  ;;  %s1473_s12 = sshll.u32 %s1600_s16, 4  ;;  %s1474_s12 = int_to_ptr.vmem [resolvable:$false] %s1473_s12 }
  0x91   : > { %v556_v22 = vld [vmem:[#allocation8] sm:$0xff]  ;;  %v557_v23 = vld [vmem:[#allocation8 + $0x8] sm:$0xff]  ;;  %v558_v25 = vld [vmem:[#allocation8 + $0x10] sm:$0xff]  ;;  %p1471_p6 = pnand %p1470_p13, %p1792_p10  ;;  %s1475_s17 = scalar_lea.vmem %s1474_s12, 4096 }
  0x92   : > { %1243 = vmatpush3.bf16.msra.mxu0 %v1240_v6  ;;  %v1244_v24 = vpack.c.bf16 %v557_v23, %v556_v22  ;;  %v559_v26 = vld [vmem:[#allocation8 + $0x18] sm:$0xff]  ;;  %p1476_p5 = scmp.lt.s32.totalorder %s2013_s27, %s1474_s12  ;;  %p1477_p7 = scmp.lt.s32.totalorder %s1475_s17, %s1469_s7 }
  0x93   : > { %v1248_v27 = vpack.c.bf16 %v559_v26, %v558_v25  ;;  %v1088_v28 = vld [vmem:[#allocation7] ss:$0 sm:$0xff]  ;;  %p1472_p3 = pneg %p1471_p6 }
  0x94   : > { %1245 = vmatprep.subr.bf16.mxu1 %v1244_v24  ;;  %p1478_p9 = por %p1477_p7, %p1476_p5 }
  0x95   : > { %1181 = vmatmul.mubr.msk.f32.vlgmr.msra.gmra.mrb[0].mxu0 %vm346_vm0, %v320_v7  ;;  %1247 = vmatpush3.bf16.msra.mxu1 %v1244_v24 }
  0x96   : > { %1183 = vmatprep.mubr.msk.f32.mxu0 %vm346_vm0, %v321_v8  ;;  %1249 = vmatprep.subr.bf16.mxu1 %v1248_v27  ;;  %p1479_p0 = pnand %p1478_p9, %p1472_p3 }
  0x99   : > { %1184 = vmatmul.mubr.msk.f32.gmra.mrb[2].mxu0 %vm346_vm0, %v322_v9  ;;  %1251 = vmatpush3.bf16.msra.mxu1 %v1248_v27 }
  0x9a   : > { %1186 = vmatprep.mubr.msk.f32.mxu0 %vm346_vm0, %v323_v10 }
  0x9d   : > { %1187 = vmatmul.mubr.msk.f32.gmra.mrb[4].mxu0 %vm346_vm0, %v324_v11 }
  0x9e   : > { %1189 = vmatprep.mubr.msk.f32.mxu0 %vm346_vm0, %v325_v12 }
  0xa1   : > { %1190 = vmatmul.mubr.msk.f32.gmra.mrb[6].mxu0 %vm346_vm0, %v326_v13 }
  0xa2   : > { %1192 = vmatprep.mubr.msk.f32.mxu0 %vm346_vm0, %v327_v14 }
  0xa5   : > { %1193 = vmatmul.mubr.msk.f32.gmra.mrb[8].mxu0 %vm346_vm0, %v328_v15 }
  0xa6   : > { %1195 = vmatprep.mubr.msk.f32.mxu0 %vm346_vm0, %v329_v16 }
  0xa9   : > { %1196 = vmatmul.mubr.msk.f32.gmra.mrb[10].mxu0 %vm346_vm0, %v330_v17 }
  0xaa   : > { %1198 = vmatprep.mubr.msk.f32.mxu0 %vm346_vm0, %v331_v18 }
  0xad   : > { %1199 = vmatmul.mubr.msk.f32.gmra.mrb[12].mxu0 %vm346_vm0, %v332_v19 }
  0xae   : > { %1201 = vmatprep.mubr.msk.f32.mxu0 %vm346_vm0, %v333_v20 }
  0xb1   : > { %1202 = vmatmul.mubr.msk.f32.gmra.mrb[14].mxu0 %vm346_vm0, %v334_v21 }
 0x168   : > { %v1182_v29 = vpop.f32.mrb[0].mxu0 }
 0x169   : > { %v467_v30 = vadd.f32 %v1182_v29, %v1088_v28  ;;  %v461_v31 = vpop.f32.mrb[1].mxu0 }
 0x16a   : > { %v462_v32 = vadd.f32 %v1088_v28, %v461_v31 }
 0x16b   : > { %541 = vst.msk [vmem:[%s1907_s26 + $0x8] sm:$0xff] %vm346_vm0, %v467_v30 }
 0x16c   : > { %540 = vst.msk [vmem:[%s1907_s26] sm:$0xff] %vm346_vm0, %v462_v32  ;;  %v1185_v33 = vpop.f32.mrb[2].mxu0  ;;  %576 = vrot.lane.b32.xlu0 %v462_v32, %s1599_s28 }
 0x16d   : > { %v477_v34 = vadd.f32 %v1185_v33, %v1088_v28  ;;  %v471_v35 = vpop.f32.mrb[3].mxu0 }
 0x16e   : > { %v472_v36 = vadd.f32 %v1088_v28, %v471_v35 }
 0x16f   : > { %543 = vst.msk [vmem:[%s1907_s26 + $0x18] sm:$0xff] %vm346_vm0, %v477_v34 }
 0x170   : > { %542 = vst.msk [vmem:[%s1907_s26 + $0x10] sm:$0xff] %vm346_vm0, %v472_v36  ;;  %580 = vrot.lane.b32.xlu1 %v472_v36, %s1599_s28  ;;  %578 = vrot.lane.b32.xlu0 %v467_v30, %s1599_s28  ;;  %v1188_v37 = vpop.f32.mrb[4].mxu0 }
 0x171   : > { %v487_v38 = vadd.f32 %v1188_v37, %v1088_v28  ;;  %v481_v39 = vpop.f32.mrb[5].mxu0 }
 0x172   : > { %v482_v40 = vadd.f32 %v1088_v28, %v481_v39 }
 0x173   : > { %545 = vst.msk [vmem:[%s1907_s26 + $0x28] sm:$0xff] %vm346_vm0, %v487_v38 }
 0x174   : > { %544 = vst.msk [vmem:[%s1907_s26 + $0x20] sm:$0xff] %vm346_vm0, %v482_v40  ;;  %582 = vrot.lane.b32.xlu1 %v477_v34, %s1599_s28  ;;  %v1191_v41 = vpop.f32.mrb[6].mxu0  ;;  %584 = vrot.lane.b32.xlu0 %v482_v40, %s1599_s28 }
 0x175   : > { %v497_v42 = vadd.f32 %v1191_v41, %v1088_v28  ;;  %v491_v43 = vpop.f32.mrb[7].mxu0 }
 0x176   : > { %v492_v44 = vadd.f32 %v1088_v28, %v491_v43 }
 0x177   : > { %547 = vst.msk [vmem:[%s1907_s26 + $0x38] sm:$0xff] %vm346_vm0, %v497_v42 }
 0x178   : > { %546 = vst.msk [vmem:[%s1907_s26 + $0x30] sm:$0xff] %vm346_vm0, %v492_v44  ;;  %586 = vrot.lane.b32.xlu1 %v487_v38, %s1599_s28  ;;  %v1194_v45 = vpop.f32.mrb[8].mxu0  ;;  %588 = vrot.lane.b32.xlu0 %v492_v44, %s1599_s28 }
 0x179   : > { %v507_v46 = vadd.f32 %v1194_v45, %v1088_v28  ;;  %v501_v47 = vpop.f32.mrb[9].mxu0 }
 0x17a   : > { %v502_v48 = vadd.f32 %v1088_v28, %v501_v47 }
 0x17b   : > { %549 = vst.msk [vmem:[%s1907_s26 + $0x48] sm:$0xff] %vm346_vm0, %v507_v46 }
 0x17c   : > { %548 = vst.msk [vmem:[%s1907_s26 + $0x40] sm:$0xff] %vm346_vm0, %v502_v48  ;;  %590 = vrot.lane.b32.xlu1 %v497_v42, %s1599_s28  ;;  %v1197_v49 = vpop.f32.mrb[10].mxu0  ;;  %592 = vrot.lane.b32.xlu0 %v502_v48, %s1599_s28 }
 0x17d   : > { %v517_v50 = vadd.f32 %v1197_v49, %v1088_v28  ;;  %v511_v51 = vpop.f32.mrb[11].mxu0 }
 0x17e   : > { %v512_v52 = vadd.f32 %v1088_v28, %v511_v51 }
 0x17f   : > { %551 = vst.msk [vmem:[%s1907_s26 + $0x58] sm:$0xff] %vm346_vm0, %v517_v50 }
 0x180   : > { %550 = vst.msk [vmem:[%s1907_s26 + $0x50] sm:$0xff] %vm346_vm0, %v512_v52  ;;  %594 = vrot.lane.b32.xlu1 %v507_v46, %s1599_s28  ;;  %v1200_v53 = vpop.f32.mrb[12].mxu0  ;;  %596 = vrot.lane.b32.xlu0 %v512_v52, %s1599_s28 }
 0x181   : > { %v527_v54 = vadd.f32 %v1200_v53, %v1088_v28  ;;  %v521_v55 = vpop.f32.mrb[13].mxu0 }
 0x182   : > { %v522_v56 = vadd.f32 %v1088_v28, %v521_v55 }
 0x183   : > { %553 = vst.msk [vmem:[%s1907_s26 + $0x68] sm:$0xff] %vm346_vm0, %v527_v54 }
 0x184   : > { %552 = vst.msk [vmem:[%s1907_s26 + $0x60] sm:$0xff] %vm346_vm0, %v522_v56  ;;  %598 = vrot.lane.b32.xlu1 %v517_v50, %s1599_s28  ;;  %v1203_v57 = vpop.f32.mrb[14].mxu0  ;;  %600 = vrot.lane.b32.xlu0 %v522_v56, %s1599_s28 }
 0x185   : > { %v537_v58 = vadd.f32 %v1203_v57, %v1088_v28  ;;  %v531_v59 = vpop.f32.mrb[15].mxu0 }
 0x186   : > { %v532_v60 = vadd.f32 %v1088_v28, %v531_v59 }
 0x187   : > { %555 = vst.msk [vmem:[%s1907_s26 + $0x78] sm:$0xff] %vm346_vm0, %v537_v58 }
 0x188   : > { %554 = vst.msk [vmem:[%s1907_s26 + $0x70] sm:$0xff] %vm346_vm0, %v532_v60  ;;  %602 = vrot.lane.b32.xlu1 %v527_v54, %s1599_s28  ;;  %604 = vrot.lane.b32.xlu0 %v532_v60, %s1599_s28 }
 0x18c   : > { %606 = vrot.lane.b32.xlu1 %v537_v58, %s1599_s28 }
 0x1de   : > { %v577_v61 = vpop.permute.xlu0 %576 }
 0x1df   : > { %1212 = vmatprep.mubr.msk.f32.mxu1 %vm346_vm0, %v577_v61 }
 0x1e2   : > { %v581_v62 = vpop.permute.xlu1 %580  ;;  %v579_v63 = vpop.permute.xlu0 %578 }
 0x1e3   : > { %1213 = vmatmul.mubr.msk.f32.vlgmr.msra.gmra.mrb[0].mxu1 %vm346_vm0, %v579_v63 }
 0x1e4   : > { %1215 = vmatprep.mubr.msk.f32.mxu1 %vm346_vm0, %v581_v62 }
 0x1e6   : > { %v583_v0 = vpop.permute.xlu1 %582  ;;  %v585_v1 = vpop.permute.xlu0 %584 }
 0x1e7   : > { %1216 = vmatmul.mubr.msk.f32.gmra.mrb[2].mxu1 %vm346_vm0, %v583_v0 }
 0x1e8   : > { %1218 = vmatprep.mubr.msk.f32.mxu1 %vm346_vm0, %v585_v1 }
 0x1ea   : > { %v587_v2 = vpop.permute.xlu1 %586  ;;  %v589_v3 = vpop.permute.xlu0 %588 }
 0x1eb   : > { %1219 = vmatmul.mubr.msk.f32.gmra.mrb[4].mxu1 %vm346_vm0, %v587_v2 }
 0x1ec   : > { %1221 = vmatprep.mubr.msk.f32.mxu1 %vm346_vm0, %v589_v3 }
 0x1ee   : > { %v591_v4 = vpop.permute.xlu1 %590  ;;  %v593_v5 = vpop.permute.xlu0 %592 }
 0x1ef   : > { %1222 = vmatmul.mubr.msk.f32.gmra.mrb[6].mxu1 %vm346_vm0, %v591_v4 }
 0x1f0   : > { %1224 = vmatprep.mubr.msk.f32.mxu1 %vm346_vm0, %v593_v5 }
 0x1f2   : > { %v595_v6 = vpop.permute.xlu1 %594  ;;  %v597_v7 = vpop.permute.xlu0 %596 }
 0x1f3   : > { %1225 = vmatmul.mubr.msk.f32.gmra.mrb[8].mxu1 %vm346_vm0, %v595_v6 }
 0x1f4   : > { %1227 = vmatprep.mubr.msk.f32.mxu1 %vm346_vm0, %v597_v7 }
 0x1f6   : > { %v599_v8 = vpop.permute.xlu1 %598  ;;  %v601_v9 = vpop.permute.xlu0 %600 }
 0x1f7   : > { %1228 = vmatmul.mubr.msk.f32.gmra.mrb[10].mxu1 %vm346_vm0, %v599_v8 }
 0x1f8   : > { %1230 = vmatprep.mubr.msk.f32.mxu1 %vm346_vm0, %v601_v9 }
 0x1fa   : > { %v603_v10 = vpop.permute.xlu1 %602  ;;  %v605_v11 = vpop.permute.xlu0 %604 }
 0x1fb   : > { %1231 = vmatmul.mubr.msk.f32.gmra.mrb[12].mxu1 %vm346_vm0, %v603_v10 }
 0x1fc   : > { %1233 = vmatprep.mubr.msk.f32.mxu1 %vm346_vm0, %v605_v11 }
 0x1fe   : > { %v607_v12 = vpop.permute.xlu1 %606 }
 0x1ff   : > { %1234 = vmatmul.mubr.msk.f32.gmra.mrb[14].mxu1 %vm346_vm0, %v607_v12 }
 0x2b6   : > { %v1214_v13 = vpop.f32.mrb[0].mxu1 }
 0x2b7   : > { %786 = vst.msk [vmem:[%s1974_s11 + $0x8] sm:$0xff] %vm346_vm0, %v1214_v13  ;;  %819 = vrot.lane.b32.xlu1 %v1214_v13, %s1599_s28  ;;  %v706_v14 = vpop.f32.mrb[1].mxu1 }
 0x2b8   : > { %785 = vst.msk [vmem:[%s1974_s11] sm:$0xff] %vm346_vm0, %v706_v14  ;;  %817 = vrot.lane.b32.xlu0 %v706_v14, %s1599_s28 }
 0x2ba   : > { %v1217_v15 = vpop.f32.mrb[2].mxu1 }
 0x2bb   : > { %788 = vst.msk [vmem:[%s1974_s11 + $0x18] sm:$0xff] %vm346_vm0, %v1217_v15  ;;  %823 = vrot.lane.b32.xlu1 %v1217_v15, %s1599_s28  ;;  %v716_v16 = vpop.f32.mrb[3].mxu1 }
 0x2bc   : > { %787 = vst.msk [vmem:[%s1974_s11 + $0x10] sm:$0xff] %vm346_vm0, %v716_v16  ;;  %821 = vrot.lane.b32.xlu0 %v716_v16, %s1599_s28 }
 0x2be   : > { %v1220_v17 = vpop.f32.mrb[4].mxu1 }
 0x2bf   : > { %790 = vst.msk [vmem:[%s1974_s11 + $0x28] sm:$0xff] %vm346_vm0, %v1220_v17  ;;  %827 = vrot.lane.b32.xlu1 %v1220_v17, %s1599_s28  ;;  %v726_v18 = vpop.f32.mrb[5].mxu1 }
 0x2c0   : > { %789 = vst.msk [vmem:[%s1974_s11 + $0x20] sm:$0xff] %vm346_vm0, %v726_v18  ;;  %825 = vrot.lane.b32.xlu0 %v726_v18, %s1599_s28 }
 0x2c2   : > { %v1223_v19 = vpop.f32.mrb[6].mxu1 }
 0x2c3   : > { %792 = vst.msk [vmem:[%s1974_s11 + $0x38] sm:$0xff] %vm346_vm0, %v1223_v19  ;;  %831 = vrot.lane.b32.xlu1 %v1223_v19, %s1599_s28  ;;  %v736_v20 = vpop.f32.mrb[7].mxu1 }
 0x2c4   : > { %791 = vst.msk [vmem:[%s1974_s11 + $0x30] sm:$0xff] %vm346_vm0, %v736_v20  ;;  %829 = vrot.lane.b32.xlu0 %v736_v20, %s1599_s28 }
 0x2c6   : > { %v1226_v21 = vpop.f32.mrb[8].mxu1 }
 0x2c7   : > { %794 = vst.msk [vmem:[%s1974_s11 + $0x48] sm:$0xff] %vm346_vm0, %v1226_v21  ;;  %835 = vrot.lane.b32.xlu1 %v1226_v21, %s1599_s28  ;;  %v746_v22 = vpop.f32.mrb[9].mxu1 }
 0x2c8   : > { %793 = vst.msk [vmem:[%s1974_s11 + $0x40] sm:$0xff] %vm346_vm0, %v746_v22  ;;  %833 = vrot.lane.b32.xlu0 %v746_v22, %s1599_s28 }
 0x2ca   : > { %v1229_v23 = vpop.f32.mrb[10].mxu1 }
 0x2cb   : > { %1482 = shalt.err (!%p1479_p0)
}
 0x2cc   : > { %s1483_s6 = scalar_lea.hbm %s2008_s9, 2048  ;;  %s1487_s30 = scalar_lea.hbm %s2155_s4, 4096 }
 0x2cd   : > { %p1484_p4 = scmp.ne.s32.totalorder %s2008_s9, %s1483_s6  ;;  %p1488_p12 = scmp.lt.u32.totalorder %s2008_s9, %s2155_s4 }
 0x2ce   : > { %p1489_p1 = scmp.lt.u32.totalorder %s1487_s30, %s1483_s6  ;;  %p1491_p13 = scmp.lt.u32.totalorder %s1483_s6, %s2008_s9 }
 0x2cf   : > { %p1485_p2 = pnand %p1484_p4, %p1792_p10 }
 0x2d0   : > { %p1490_p11 = por %p1489_p1, %p1488_p12 }
 0x2d1   : > { %p1486_p8 = pneg %p1485_p2 }
 0x2d2   : > { %p1492_p6 = por %p1491_p13, %p1490_p11 }
 0x2d4   : > { %p1493_p3 = pnand %p1492_p6, %p1486_p8 }
 0x2d6   : > { %1496 = shalt.err (!%p1493_p3)
}
 0x2d7   : > { %s1601_s18 = smov 128   ;;  %s1602_s7 = smov 8   ;;  %796 = vst.msk [vmem:[%s1974_s11 + $0x58] sm:$0xff] %vm346_vm0, %v1229_v23  ;;  %839 = vrot.lane.b32.xlu1 %v1229_v23, %s1599_s28  ;;  %v756_v24 = vpop.f32.mrb[11].mxu1 }
 0x2d8   : > { %1266 = dma.vmem_to_hbm [thread:$0]  (%p1792_p10), %s2013_s27, 2048, %s2008_s9, %s882_s15, %s1601_s18, %s1601_s18, %s1602_s7   ;;  %v1232_v25 = vpop.f32.mrb[12].mxu1 }
 0x2d9   : > { %795 = vst.msk [vmem:[%s1974_s11 + $0x50] sm:$0xff] %vm346_vm0, %v756_v24  ;;  %837 = vrot.lane.b32.xlu0 %v756_v24, %s1599_s28  ;;  %798 = vst.msk [vmem:[%s1974_s11 + $0x68] sm:$0xff] %vm346_vm0, %v1232_v25  ;;  %v766_v26 = vpop.f32.mrb[13].mxu1  ;;  %s920_s27 = sshll.u32 %s1974_s11, 4  ;;  %s1603_s17 = smov [#allocation11]   ;;  %s2095_s27 = int_to_ptr.vmem [resolvable:$true] %s920_s27 }
 0x2da   : > { %797 = vst.msk [vmem:[%s1974_s11 + $0x60] sm:$0xff] %vm346_vm0, %v766_v26  ;;  %v1235_v27 = vpop.f32.mrb[14].mxu1  ;;  %s1497_s12 = scalar_lea.vmem %s2095_s27, 4096  ;;  %s1501_s6 = sshll.u32 %s1603_s17, 4  ;;  %s1502_s6 = int_to_ptr.vmem [resolvable:$false] %s1501_s6 }
 0x2db   : > { %843 = vrot.lane.b32.xlu1 %v1232_v25, %s1599_s28  ;;  %800 = vst.msk [vmem:[%s1974_s11 + $0x78] sm:$0xff] %vm346_vm0, %v1235_v27  ;;  %v776_v28 = vpop.f32.mrb[15].mxu1  ;;  %p1498_p5 = scmp.ne.s32.totalorder %s2095_s27, %s1497_s12  ;;  %s1503_s10 = scalar_lea.vmem %s1502_s6, 8192 }
 0x2dc   : > { %799 = vst.msk [vmem:[%s1974_s11 + $0x70] sm:$0xff] %vm346_vm0, %v776_v28  ;;  %p1504_p0 = scmp.lt.s32.totalorder %s2095_s27, %s1502_s6  ;;  %p1505_p4 = scmp.lt.s32.totalorder %s1503_s10, %s1497_s12 }
 0x2dd   : > { %841 = vrot.lane.b32.xlu0 %v766_v26, %s1599_s28  ;;  %p1499_p7 = pnand %p1498_p5, %p1792_p10 }
 0x2de   : > { %p1506_p2 = por %p1505_p4, %p1504_p0 }
 0x2df   : > { %847 = vrot.lane.b32.xlu1 %v1235_v27, %s1599_s28  ;;  %p1500_p9 = pneg %p1499_p7 }
 0x2e1   : > { %845 = vrot.lane.b32.xlu0 %v776_v28, %s1599_s28  ;;  %s1131_s28 = sshll.u32 %s1583_s21, 12  ;;  %s887_s21 = scalar_lea.sflag [#allocation12], %s1853_s24 }
 0x2e2   : > { %s2093_s16 = scalar_lea.hbm %s2156_s5, %s1131_s28  ;;  %p1507_p8 = pnand %p1506_p2, %p1500_p9 }
 0x329   : > { %v820_v29 = vpop.permute.xlu1 %819 }
 0x32a   : > { %866 = vst.msk [vmem:[%s1974_s11 + $0x88] sm:$0xff] %vm346_vm0, %v820_v29  ;;  %v818_v30 = vpop.permute.xlu0 %817 }
 0x32b   : > { %865 = vst.msk [vmem:[%s1974_s11 + $0x80] sm:$0xff] %vm346_vm0, %v818_v30 }
 0x32d   : > { %v824_v31 = vpop.permute.xlu1 %823 }
 0x32e   : > { %868 = vst.msk [vmem:[%s1974_s11 + $0x98] sm:$0xff] %vm346_vm0, %v824_v31  ;;  %v822_v32 = vpop.permute.xlu0 %821 }
 0x32f   : > { %867 = vst.msk [vmem:[%s1974_s11 + $0x90] sm:$0xff] %vm346_vm0, %v822_v32 }
 0x331   : > { %v828_v33 = vpop.permute.xlu1 %827 }
 0x332   : > { %870 = vst.msk [vmem:[%s1974_s11 + $0xa8] sm:$0xff] %vm346_vm0, %v828_v33  ;;  %v826_v34 = vpop.permute.xlu0 %825 }
 0x333   : > { %869 = vst.msk [vmem:[%s1974_s11 + $0xa0] sm:$0xff] %vm346_vm0, %v826_v34 }
 0x335   : > { %v832_v35 = vpop.permute.xlu1 %831 }
 0x336   : > { %872 = vst.msk [vmem:[%s1974_s11 + $0xb8] sm:$0xff] %vm346_vm0, %v832_v35  ;;  %v830_v36 = vpop.permute.xlu0 %829 }
 0x337   : > { %871 = vst.msk [vmem:[%s1974_s11 + $0xb0] sm:$0xff] %vm346_vm0, %v830_v36 }
 0x339   : > { %v836_v37 = vpop.permute.xlu1 %835 }
 0x33a   : > { %874 = vst.msk [vmem:[%s1974_s11 + $0xc8] sm:$0xff] %vm346_vm0, %v836_v37  ;;  %v834_v38 = vpop.permute.xlu0 %833 }
 0x33b   : > { %873 = vst.msk [vmem:[%s1974_s11 + $0xc0] sm:$0xff] %vm346_vm0, %v834_v38 }
 0x349   : > { %v840_v39 = vpop.permute.xlu1 %839 }
 0x34a   : > { %876 = vst.msk [vmem:[%s1974_s11 + $0xd8] sm:$0xff] %vm346_vm0, %v840_v39 }
 0x34b   : > { %v838_v40 = vpop.permute.xlu0 %837 }
 0x34c   : > { %875 = vst.msk [vmem:[%s1974_s11 + $0xd0] sm:$0xff] %vm346_vm0, %v838_v40 }
 0x34d   : > { %v844_v41 = vpop.permute.xlu1 %843 }
 0x34e   : > { %878 = vst.msk [vmem:[%s1974_s11 + $0xe8] sm:$0xff] %vm346_vm0, %v844_v41 }
 0x34f   : > { %v842_v42 = vpop.permute.xlu0 %841 }
 0x350   : > { %877 = vst.msk [vmem:[%s1974_s11 + $0xe0] sm:$0xff] %vm346_vm0, %v842_v42 }
 0x351   : > { %v848_v43 = vpop.permute.xlu1 %847 }
 0x352   : > { %880 = vst.msk [vmem:[%s1974_s11 + $0xf8] sm:$0xff] %vm346_vm0, %v848_v43 }
 0x353   : > { %v846_v44 = vpop.permute.xlu0 %845 }
 0x354   : > { %879 = vst.msk [vmem:[%s1974_s11 + $0xf0] sm:$0xff] %vm346_vm0, %v846_v44 }
 0x355   : > { %1510 = shalt.err (!%p1507_p8)
}
 0x356   : > { %s1511_s11 = scalar_lea.hbm %s2093_s16, 4096  ;;  %s1515_s13 = scalar_lea.hbm %s2156_s5, 8192 }
 0x357   : > { %p1512_p12 = scmp.ne.s32.totalorder %s2093_s16, %s1511_s11  ;;  %p1516_p13 = scmp.lt.u32.totalorder %s2093_s16, %s2156_s5 }
 0x358   : > { %p1517_p6 = scmp.lt.u32.totalorder %s1515_s13, %s1511_s11  ;;  %p1519_p5 = scmp.lt.u32.totalorder %s1511_s11, %s2093_s16 }
 0x359   : > { %p1513_p1 = pnand %p1512_p12, %p1792_p10 }
 0x35a   : > { %p1518_p3 = por %p1517_p6, %p1516_p13 }
 0x35b   : > { %p1514_p11 = pneg %p1513_p1 }
 0x35c   : > { %p1520_p7 = por %p1519_p5, %p1518_p3 }
 0x35e   : > { %p1521_p9 = pnand %p1520_p7, %p1514_p11 }
 0x360   : > { %1524 = shalt.err (!%p1521_p9)
}
 0x361   : > { %1267 = dma.vmem_to_hbm [thread:$0]  (%p1792_p10), %s2095_s27, 4096, %s2093_s16, %s887_s21, %s1601_s18, %s1601_s18, %s1602_s7  }
 0x362 PF: > { %s2178_s9 = sld [smem:[#allocation18_spill]]  ;;  %s2179_s15 = sld [smem:[#allocation19_spill]] }
 0x363   : > { %p2181_p4 = scmp.ge.s32.totalorder %s1591_s23, 2 }
 0x368   : > { %s935_s12 = sand.u32 1, %s2178_s9   ;;  %p2180_p0 = scmp.ne.s32.totalorder %s2179_s15, 0 }
 0x369   : > { %s936_s17 = scalar_lea.sflag [#allocation4], %s935_s12 }
 0x36a   : > { %p1285_p2 = pnand %p2181_p4, %p2180_p0 }
 0x36c   : > { %1562 = dma.done.wait (!%p1285_p2), %s936_s17, 2048  }
 0x36d   : > { %1564 = vsyncadd (!%p1285_p2), %s936_s17, 4294965248  ;;  %s945_s29 = scalar_lea.sflag [#allocation12], %s935_s12 }
 0x36e   : > { %1566 = dma.done.wait (!%p1285_p2), %s945_s29, 4096  }
 0x36f   : > { %1568 = vsyncadd (!%p1285_p2), %s945_s29, 4294963200  ;;  %s27_s23 = sadd.s32 1, %s1591_s23   ;;  %s2182_s18 = smov %s1575_s19 }
 0x370   : > { %p24_p8 = scmp.ge.s32.totalorder %s27_s23, 4   ;;  %s2183_s19 = smov %s1579_s20 }
 0x371   : > { %s2184_s20 = smov %s1804_s25  ;;  %s2185_s21 = smov %s1587_s22 }
 0x372   : > { %s2186_s22 = smov %s2188_s8  ;;  %26 = sbr.rel (!%p24_p8) target bundleno = 10 (0xa), region = 110 }
 0x379   :  { %950 = vsyncpa [#allocation3], 1 }
 0x37a   :  { %952 = vsyncpa [#allocation3 + $0x1], 1 }
 0x37b   :  { %953 = vsyncpa [#allocation6], 1 }
 0x37c   :  { %954 = vsyncpa [#allocation9], 1 }
 0x37d   :  { %955 = vsyncpa [#allocation4], 1 }
 0x37e   :  { %957 = vsyncpa [#allocation4 + $0x1], 1 }
 0x37f   :  { %958 = vsyncpa [#allocation12], 1 }
 0x380   :  { %960 = vsyncpa [#allocation12 + $0x1], 1 }

</bundles_post_ra>
